<compile_context>
chip_gen: v7x
topology: tpu7x:2x2x1
jax: 0.10.0
libtpu: 0.0.40
codegen_flags: <defaults>
</compile_context>

<pallas_src>
import functools
import math

import jax
import jax.numpy as jnp
from jax import lax
from jax.experimental import pallas as pl
from jax.experimental.pallas import tpu as pltpu

KERNEL_SIZE = 3
FEATURE_MAPS = 4

_COMPILER_PARAMS = pltpu.CompilerParams(
    dimension_semantics=("parallel",),
)


def _round_up(x, m):
    return (x + m - 1) // m * m


# -----------------------------------------------------------------------------
# pltpu.roll direction probe (resolved once, outside the hot path)
# -----------------------------------------------------------------------------
def _roll_probe_kernel(x_ref, o_ref):
    o_ref[...] = pltpu.roll(x_ref[...], 1, 1)


@functools.lru_cache(maxsize=None)
def _roll_is_jnp_like():
    """True if pltpu.roll matches jnp.roll semantics (out[i] == in[(i-s) % n])."""
    x = jnp.arange(8 * 128, dtype=jnp.float32).reshape(8, 128)
    y = pl.pallas_call(
        _roll_probe_kernel,
        out_shape=jax.ShapeDtypeStruct((8, 128), jnp.float32),
    )(x)
    v = float(jax.device_get(y)[0, 0])
    if v == 127.0:
        return True
    if v == 1.0:
        return False
    raise RuntimeError(f"unexpected pltpu.roll semantics (probe value {v})")


# -----------------------------------------------------------------------------
# In-kernel building blocks
# -----------------------------------------------------------------------------
def _shift_lanes(x, off, roll_jnp_like):
    """Return y with y[:, p] = x[:, (p + off) % L]  (lane axis shift)."""
    if off == 0:
        return x
    L = x.shape[-1]
    shift = (-off) % L if roll_jnp_like else off % L
    return pltpu.roll(x, shift, 1)


def _conv3x3_acc(x, w_ref, stride, roll_jnp_like, acc=None):
    """Accumulate a valid 3x3 conv in the lane-dense layout.

    x     : (Cin, L) f32 value; image rows flattened on lanes with row stride
            `stride`; L is a multiple of 128.
    w_ref : (9, Cout, Cin) ref, tap index k = kh*3 + kw.
    Returns (Cout, L); column p is the conv output for flattened position p,
    columns whose receptive field crosses the right/bottom edge hold finite
    garbage (cropped by the wrapper).
    """
    for kh in range(3):
        for kw in range(3):
            off = kh * stride + kw
            xs = _shift_lanes(x, off, roll_jnp_like)
            t = jnp.dot(w_ref[kh * 3 + kw], xs,
                        preferred_element_type=jnp.float32)
            acc = t if acc is None else acc + t
    return acc


def _double_conv_kernel(x_ref, w1_ref, b1_ref, w2_ref, b2_ref, o_ref, *,
                        stride, roll_jnp_like):
    """Fused conv3x3 + ReLU + conv3x3 + ReLU (one UNet encoder block)."""
    y1 = _conv3x3_acc(x_ref[0], w1_ref, stride, roll_jnp_like) + b1_ref[...]
    y1 = jnp.maximum(y1, 0.0)
    y2 = _conv3x3_acc(y1, w2_ref, stride, roll_jnp_like) + b2_ref[...]
    o_ref[0] = jnp.maximum(y2, 0.0)


def _decode_core(xd_ref, xs_ref, wt_ref, bt_ref, w1u_ref, w1s_ref, b1_ref,
                 w2_ref, b2_ref, stride, roll_jnp_like):
    """ConvTranspose2d(stride=2) (as valid conv on a zero-dilated input) ->
    crop_and_concat -> conv3x3+ReLU -> conv3x3+ReLU, all in VMEM.

    The channel concat [upsampled, bypass] is folded into conv1 by splitting its
    weights into the two input-channel groups (w1u / w1s), so no in-kernel
    concatenation is needed.
    """
    up = _conv3x3_acc(xd_ref[0], wt_ref, stride, roll_jnp_like) + bt_ref[...]
    y1 = _conv3x3_acc(up, w1u_ref, stride, roll_jnp_like)
    y1 = _conv3x3_acc(xs_ref[0], w1s_ref, stride, roll_jnp_like, acc=y1)
    y1 = jnp.maximum(y1 + b1_ref[...], 0.0)
    y2 = _conv3x3_acc(y1, w2_ref, stride, roll_jnp_like) + b2_ref[...]
    return jnp.maximum(y2, 0.0)


def _decode_block_kernel(xd_ref, xs_ref, wt_ref, bt_ref, w1u_ref, w1s_ref,
                         b1_ref, w2_ref, b2_ref, o_ref, *,
                         stride, roll_jnp_like):
    o_ref[0] = _decode_core(xd_ref, xs_ref, wt_ref, bt_ref, w1u_ref, w1s_ref,
                            b1_ref, w2_ref, b2_ref, stride, roll_jnp_like)


def _decode_final_kernel(xd_ref, xs_ref, wt_ref, bt_ref, w1u_ref, w1s_ref,
                         b1_ref, w2_ref, b2_ref, wf_ref, bf_ref, u_ref, f_ref,
                         *, stride, roll_jnp_like):
    """Decoder block with the trailing 1x1 'final' conv fused in."""
    y2 = _decode_core(xd_ref, xs_ref, wt_ref, bt_ref, w1u_ref, w1s_ref,
                      b1_ref, w2_ref, b2_ref, stride, roll_jnp_like)
    u_ref[0] = y2
    f_ref[0] = jnp.dot(wf_ref[...], y2,
                       preferred_element_type=jnp.float32) + bf_ref[...]


# -----------------------------------------------------------------------------
# Weight reshaping helpers (XLA side, tiny)
# -----------------------------------------------------------------------------
def _w9(w_oihw):
    """(Cout, Cin, 3, 3) -> (9, Cout, Cin) with tap index k = kh*3 + kw."""
    cout, cin = w_oihw.shape[0], w_oihw.shape[1]
    return jnp.transpose(w_oihw, (2, 3, 0, 1)).reshape(9, cout, cin)


def _wt_as_conv(w_iohw):
    """ConvTranspose2d weight (Cin, Cout, 3, 3) -> equivalent valid-conv OIHW."""
    return jnp.transpose(w_iohw[:, :, ::-1, ::-1], (1, 0, 2, 3))


# -----------------------------------------------------------------------------
# Pallas wrappers (one pallas_call per UNet block)
# -----------------------------------------------------------------------------
def double_conv_block(x_nchw, p):
    """Fused [conv3x3+ReLU, conv3x3+ReLU] (valid padding).

    x_nchw: dense (N, Cin, H, W) f32.
    Returns (out, (W, H-4, W-4)): `out` is (N, C2, L) with the output rows
    flattened on the lane axis at row stride W; columns beyond the valid width
    W-4 (and lanes >= (H-4)*W) are finite garbage cropped by consumers.
    """
    N, Cin, H, W = x_nchw.shape
    w1, b1 = p["c1"]["w"], p["c1"]["b"]
    w2, b2 = p["c2"]["w"], p["c2"]["b"]
    C1, C2 = w1.shape[0], w2.shape[0]
    L = _round_up(H * W, 128)
    xf = jnp.pad(x_nchw.reshape(N, Cin, H * W).astype(jnp.float32),
                 ((0, 0), (0, 0), (0, L - H * W)))
    kernel = functools.partial(_double_conv_kernel, stride=W,
                               roll_jnp_like=_roll_is_jnp_like())
    out = pl.pallas_call(
        kernel,
        out_shape=jax.ShapeDtypeStruct((N, C2, L), jnp.float32),
        grid=(N,),
        in_specs=[
            pl.BlockSpec((1, Cin, L), lambda n: (n, 0, 0)),
            pl.BlockSpec((9, C1, Cin), lambda n: (0, 0, 0)),
            pl.BlockSpec((C1, 1), lambda n: (0, 0)),
            pl.BlockSpec((9, C2, C1), lambda n: (0, 0, 0)),
            pl.BlockSpec((C2, 1), lambda n: (0, 0)),
        ],
        out_specs=pl.BlockSpec((1, C2, L), lambda n: (n, 0, 0)),
        compiler_params=_COMPILER_PARAMS,
    )(xf, _w9(w1), b1.reshape(C1, 1), _w9(w2), b2.reshape(C2, 1))
    return out, (W, H - 4, W - 4)


def decode_block(x_low, skip, up_p, conv_p, final_p=None):
    """Fused [ConvTranspose2d(stride=2), crop_and_concat, conv+ReLU, conv+ReLU
    (+ optional final 1x1 conv)] as ONE pallas_call.

    x_low : dense (N, Ci, h, w)        -- low-resolution decoder input
    skip  : dense (N, Cs, 2h+1, 2w+1)  -- already-cropped encoder bypass
    """
    N, Ci, h, w = x_low.shape
    Cs = skip.shape[1]
    wt, bt = up_p["w"], up_p["b"]            # ConvTranspose2d: (Ci, Cu, 3, 3)
    Cu = wt.shape[1]
    w1, b1 = conv_p["c1"]["w"], conv_p["c1"]["b"]
    w2, b2 = conv_p["c2"]["w"], conv_p["c2"]["b"]
    C1, C2 = w1.shape[0], w2.shape[0]

    Hd, Wd = 2 * h + 3, 2 * w + 3            # zero-dilated + padded ConvT input
    Hu, Wu = Hd - 2, Wd - 2                  # ConvT output spatial (2h+1, 2w+1)
    L = _round_up(Hd * Wd, 128)

    zero = jnp.array(0.0, jnp.float32)
    xd = lax.pad(x_low.astype(jnp.float32), zero,
                 ((0, 0, 0), (0, 0, 0), (2, 2, 1), (2, 2, 1)))    # (N,Ci,Hd,Wd)
    xd = jnp.pad(xd.reshape(N, Ci, Hd * Wd),
                 ((0, 0), (0, 0), (0, L - Hd * Wd)))
    # Bypass: pad width to the shared row stride Wd, flatten, tail-pad to L.
    xs = jnp.pad(skip.astype(jnp.float32),
                 ((0, 0), (0, 0), (0, 0), (0, Wd - Wu)))
    xs = jnp.pad(xs.reshape(N, Cs, Hu * Wd),
                 ((0, 0), (0, 0), (0, L - Hu * Wd)))

    w1u, w1s = w1[:, :Cu], w1[:, Cu:]        # concat([up, skip]) -> split conv1

    args = [xd, xs, _w9(_wt_as_conv(wt)), bt.reshape(Cu, 1),
            _w9(w1u), _w9(w1s), b1.reshape(C1, 1),
            _w9(w2), b2.reshape(C2, 1)]
    in_specs = [
        pl.BlockSpec((1, Ci, L), lambda n: (n, 0, 0)),
        pl.BlockSpec((1, Cs, L), lambda n: (n, 0, 0)),
        pl.BlockSpec((9, Cu, Ci), lambda n: (0, 0, 0)),
        pl.BlockSpec((Cu, 1), lambda n: (0, 0)),
        pl.BlockSpec((9, C1, Cu), lambda n: (0, 0, 0)),
        pl.BlockSpec((9, C1, Cs), lambda n: (0, 0, 0)),
        pl.BlockSpec((C1, 1), lambda n: (0, 0)),
        pl.BlockSpec((9, C2, C1), lambda n: (0, 0, 0)),
        pl.BlockSpec((C2, 1), lambda n: (0, 0)),
    ]
    geom = (Wd, Hu - 4, Wu - 4)

    if final_p is None:
        kernel = functools.partial(_decode_block_kernel, stride=Wd,
                                   roll_jnp_like=_roll_is_jnp_like())
        out = pl.pallas_call(
            kernel,
            out_shape=jax.ShapeDtypeStruct((N, C2, L), jnp.float32),
            grid=(N,),
            in_specs=in_specs,
            out_specs=pl.BlockSpec((1, C2, L), lambda n: (n, 0, 0)),
            compiler_params=_COMPILER_PARAMS,
        )(*args)
        return out, geom

    wf, bf = final_p["w"], final_p["b"]
    Cf = wf.shape[0]
    kernel = functools.partial(_decode_final_kernel, stride=Wd,
                               roll_jnp_like=_roll_is_jnp_like())
    args += [wf.reshape(Cf, C2), bf.reshape(Cf, 1)]
    in_specs += [pl.BlockSpec((Cf, C2), lambda n: (0, 0)),
                 pl.BlockSpec((Cf, 1), lambda n: (0, 0))]
    u, f = pl.pallas_call(
        kernel,
        out_shape=(jax.ShapeDtypeStruct((N, C2, L), jnp.float32),
                   jax.ShapeDtypeStruct((N, Cf, L), jnp.float32)),
        grid=(N,),
        in_specs=in_specs,
        out_specs=(pl.BlockSpec((1, C2, L), lambda n: (n, 0, 0)),
                   pl.BlockSpec((1, Cf, L), lambda n: (n, 0, 0))),
        compiler_params=_COMPILER_PARAMS,
    )(*args)
    return (u, f), geom


# -----------------------------------------------------------------------------
# Tiny XLA glue between blocks (strided -> dense views, pool, skip crop)
# -----------------------------------------------------------------------------
def _valid_from_strided(x_s, stride, Ho, Wo):
    N, C = x_s.shape[0], x_s.shape[1]
    return x_s[:, :, :Ho * stride].reshape(N, C, Ho, stride)[:, :, :, :Wo]


def _pool2x2_from_strided(x_s, stride, Ho, Wo):
    x = _valid_from_strided(x_s, stride, Ho, Wo)
    N, C = x.shape[0], x.shape[1]
    Hp, Wp = Ho // 2, Wo // 2
    x = x[:, :, :Hp * 2, :Wp * 2].reshape(N, C, Hp, 2, Wp, 2)
    return jnp.max(x, axis=(3, 5))


def _crop_skip(bypass_s, geom, low_h):
    """crop_and_concat's bypass crop (torch F.pad with negative pads)."""
    stride, Ho, Wo = geom
    up_size = 2 * low_h + 1
    size = Ho - up_size
    c = size // 2
    lo = c + 1 if size % 2 else c
    x = _valid_from_strided(bypass_s, stride, Ho, Wo)
    return x[:, :, lo:lo + up_size, lo:lo + up_size]


# -----------------------------------------------------------------------------
# Parameters (deterministic, PyTorch-shaped)
# -----------------------------------------------------------------------------
def _init_conv(key, cin, cout, k):
    kw, kb = jax.random.split(key)
    bound = 1.0 / math.sqrt(cin * k * k)
    w = jax.random.uniform(kw, (cout, cin, k, k), jnp.float32, -bound, bound)
    b = jax.random.uniform(kb, (cout,), jnp.float32, -bound, bound)
    return {"w": w, "b": b}


def _init_convT(key, cin, cout, k):
    kw, kb = jax.random.split(key)
    bound = 1.0 / math.sqrt(cout * k * k)
    w = jax.random.uniform(kw, (cin, cout, k, k), jnp.float32, -bound, bound)
    b = jax.random.uniform(kb, (cout,), jnp.float32, -bound, bound)
    return {"w": w, "b": b}


def init_unet_params(key, kernel_size=KERNEL_SIZE, feature=FEATURE_MAPS):
    keys = jax.random.split(key, 18)
    f = feature

    def block(i0, i1, cin, cout):
        return {"c1": _init_conv(keys[i0], cin, cout, kernel_size),
                "c2": _init_conv(keys[i1], cout, cout, kernel_size)}

    return {
        "encode1": block(0, 1, 1, f),
        "encode2": block(2, 3, f, 2 * f),
        "encode3": block(4, 5, 2 * f, 4 * f),
        "center":  block(6, 7, 4 * f, 8 * f),
        "decode3": block(8, 9, 8 * f, 4 * f),
        "decode2": block(10, 11, 4 * f, 2 * f),
        "decode1": block(12, 13, 2 * f, f),
        "up3": _init_convT(keys[14], 8 * f, 4 * f, kernel_size),
        "up2": _init_convT(keys[15], 4 * f, 2 * f, kernel_size),
        "up1": _init_convT(keys[16], 2 * f, f, kernel_size),
        "final": _init_conv(keys[17], f, 2, 1),
    }


# -----------------------------------------------------------------------------
# UNet forward (Pallas path): 7 pallas_calls total
# -----------------------------------------------------------------------------
def unet_forward(params, x_nchw):
    x = x_nchw.astype(jnp.float32)

    # ----- encoder: one fused Pallas call per block -----
    d1, g1 = double_conv_block(x, params["encode1"])
    d2, g2 = double_conv_block(_pool2x2_from_strided(d1, *g1), params["encode2"])
    d3, g3 = double_conv_block(_pool2x2_from_strided(d2, *g2), params["encode3"])
    c,  gc = double_conv_block(_pool2x2_from_strided(d3, *g3), params["center"])

    # ----- decoder: ConvT + crop&concat + double conv fused per block -----
    c_d = _valid_from_strided(c, *gc)
    u3, gu3 = decode_block(c_d, _crop_skip(d3, g3, c_d.shape[2]),
                           params["up3"], params["decode3"])
    u3_d = _valid_from_strided(u3, *gu3)
    u2, gu2 = decode_block(u3_d, _crop_skip(d2, g2, u3_d.shape[2]),
                           params["up2"], params["decode2"])
    u2_d = _valid_from_strided(u2, *gu2)
    (u1, f), gu1 = decode_block(u2_d, _crop_skip(d1, g1, u2_d.shape[2]),
                                params["up1"], params["decode1"],
                                final_p=params["final"])

    out = _valid_from_strided(f, *gu1)            # (N, 2, 3, 3)
    u1_valid = _valid_from_strided(u1, *gu1)
    # TODO(synk): getFrequencyOfDeadNeurons is undefined in the reference code;
    # approximated as the fraction of zero post-ReLU activations of decode1.
    # It does not affect the returned output.
    freq_of_dead_neurons = jnp.mean((u1_valid == 0.0).astype(jnp.float32))
    return out, freq_of_dead_neurons


# -----------------------------------------------------------------------------
# Pure-JAX reference (NCHW, mirrors the PyTorch module) for verification
# -----------------------------------------------------------------------------
def _ref_conv(x, w, b, relu):
    y = lax.conv_general_dilated(x, w, (1, 1), "VALID",
                                 dimension_numbers=("NCHW", "OIHW", "NCHW"))
    y = y + b[None, :, None, None]
    return jnp.maximum(y, 0.0) if relu else y


def _ref_maxpool(x):
    return lax.reduce_window(x, -jnp.inf, lax.max, (1, 1, 2, 2),
                             (1, 1, 2, 2), "VALID")


def _ref_convT(x, w, b):
    K = w.shape[-1]
    wf = jnp.transpose(w[:, :, ::-1, ::-1], (1, 0, 2, 3))
    y = lax.conv_general_dilated(x, wf, (1, 1),
                                 padding=[(K - 1, K - 1), (K - 1, K - 1)],
                                 lhs_dilation=(2, 2),
                                 dimension_numbers=("NCHW", "OIHW", "NCHW"))
    return y + b[None, :, None, None]


def _ref_crop_concat(up, bypass):
    size = bypass.shape[2] - up.shape[2]
    c = size // 2
    lo = c if size % 2 == 0 else c + 1
    bypass = bypass[:, :, lo: bypass.shape[2] - c, lo: bypass.shape[3] - c]
    return jnp.concatenate([up, bypass], axis=1)


def unet_reference(params, x):
    def convolve(x, p):
        x = _ref_conv(x, p["c1"]["w"], p["c1"]["b"], True)
        x = _ref_conv(x, p["c2"]["w"], p["c2"]["b"], True)
        return x

    d1 = convolve(x, params["encode1"])
    d2 = convolve(_ref_maxpool(d1), params["encode2"])
    d3 = convolve(_ref_maxpool(d2), params["encode3"])
    c = convolve(_ref_maxpool(d3), params["center"])
    u3 = convolve(_ref_crop_concat(
        _ref_convT(c, params["up3"]["w"], params["up3"]["b"]), d3),
        params["decode3"])
    u2 = convolve(_ref_crop_concat(
        _ref_convT(u3, params["up2"]["w"], params["up2"]["b"]), d2),
        params["decode2"])
    u1 = convolve(_ref_crop_concat(
        _ref_convT(u2, params["up1"]["w"], params["up1"]["b"]), d1),
        params["decode1"])
    return _ref_conv(u1, params["final"]["w"], params["final"]["b"], False)


# -----------------------------------------------------------------------------
if __name__ == "__main__":
    key = jax.random.PRNGKey(0)
    pkey, xkey = jax.random.split(key)
    params = init_unet_params(pkey)

    # Smallest spatial size that survives 3 valid-conv levels with k=3 is 84.
    x = jax.random.normal(xkey, (2, 1, 84, 84), jnp.float32)  # NCHW like PyTorch

    _roll_is_jnp_like()  # resolve the roll-direction probe before tracing

    fwd = jax.jit(unet_forward)
    out, _freq_dead = fwd(params, x)
    out = jax.block_until_ready(out)
    assert out.shape == (2, 2, 3, 3), out.shape

    ref = jax.block_until_ready(unet_reference(params, x))
    max_err = float(jnp.max(jnp.abs(out - ref)))
    assert jnp.allclose(out, ref, rtol=2e-3, atol=2e-3), max_err

    print("KERNEL_OK")
</pallas_src>

<mosaic_0001>
module attributes {stable_mosaic.version = 11 : i64} {
  func.func @_roll_probe_kernel(%arg0: memref<8x128xf32, #tpu.memory_space<vmem>>, %arg1: memref<8x128xf32, #tpu.memory_space<vmem>>) attributes {dimension_semantics = [], scalar_prefetch = 0 : i64, scratch_operands = 0 : i64, tpu.core_type = #tpu.core_type<tc>} {
    %c0 = arith.constant 0 : index
    %c0_0 = arith.constant 0 : index
    %0 = vector.load %arg0[%c0, %c0_0] : memref<8x128xf32, #tpu.memory_space<vmem>>, vector<8x128xf32>
    %c1_i32 = arith.constant 1 : i32
    %1 = tpu.dynamic_rotate %0 by %c1_i32 dim 1 : vector<8x128xf32>, i32 -> vector<8x128xf32>
    %c0_1 = arith.constant 0 : index
    %c0_2 = arith.constant 0 : index
    %2 = vector.load %arg1[%c0_1, %c0_2] : memref<8x128xf32, #tpu.memory_space<vmem>>, vector<8x128xf32>
    tpu.vector_store %arg1[%c0_1, %c0_2], %1 {strides = array<i32>} : memref<8x128xf32, #tpu.memory_space<vmem>>, vector<8x128xf32>,
    return
  }
}

</mosaic_0001>

<bundles_post_ra>
// kernel: tpu_custom_call.1
= control target key start
LH: loop header
LB: loop body
LE: loop exit
PB: predicated region body
PF: predicated region fallthrough
CT: control target
= control target key end

     0   :  { %6 = vsyncpa [#allocation3], 0  ;;  %s128_s0 = inlined_call_operand.hbm [shape: f32[8,128], index: 0, kind: input, shape index: {}]   ;;  %s129_s1 = inlined_call_operand.hbm [shape: f32[8,128], index: 1, kind: output, shape index: {}]  }
   0x1   :  { %7 = vsyncpa [#allocation4], 0  ;;  %s91_s6 = smov [#allocation2]   ;;  %s43_s10 = scalar_lea.hbm %s128_s0, 128 }
   0x2   :  { %s14_s7 = sshll.u32 %s91_s6, 4  ;;  %p44_p0 = scmp.ne.s32.totalorder %s128_s0, %s43_s10  ;;  %s15_s7 = int_to_ptr.vmem [resolvable:$true] %s14_s7 }
   0x3   :  { %p47_p1 = scmp.lt.u32.totalorder %s43_s10, %s128_s0 }
   0x5   :  { %p49_p2 = pnand %p47_p1, %p44_p0 }
   0x7   :  { %52 = shalt.err (!%p49_p2)
}
   0x8   :  { %s53_s15 = scalar_lea.vmem %s15_s7, 128  ;;  %p58_p4 = scmp.lt.s32.totalorder %s15_s7, %s15_s7 }
   0x9   :  { %p54_p3 = scmp.ne.s32.totalorder %s15_s7, %s53_s15  ;;  %p59_p5 = scmp.lt.s32.totalorder %s53_s15, %s53_s15 }
   0xb   :  { %p60_p6 = por %p59_p5, %p58_p4 }
   0xd   :  { %p61_p7 = pnand %p60_p6, %p54_p3 }
   0xf   :  { %64 = shalt.err (!%p61_p7)
}
  0x10   :  { %17 = dma.hbm_to_vmem [thread:$0]  %s128_s0, 128, %s15_s7, [#allocation3]  }
  0x11   :  { %87 = dma.done.wait [#allocation3], 128  }
  0x12   :  { %88 = vsyncadd [#allocation3], 4294967168  ;;  %v21_v0 = vld [vmem:[#allocation2] sm:$0xff]  ;;  %s92_s18 = smov 1   ;;  %s93_s19 = smov [#allocation5]  }
  0x13   :  { %22 = vrot.lane.b32.xlu0 %v21_v0, %s92_s18  ;;  %s31_s20 = sshll.u32 %s93_s19, 4  ;;  %s32_s20 = int_to_ptr.vmem [resolvable:$true] %s31_s20 }
  0x14   :  { %s65_s21 = scalar_lea.vmem %s32_s20, 128  ;;  %p70_p9 = scmp.lt.s32.totalorder %s32_s20, %s32_s20 }
  0x15   :  { %p66_p8 = scmp.ne.s32.totalorder %s32_s20, %s65_s21  ;;  %p71_p10 = scmp.lt.s32.totalorder %s65_s21, %s65_s21 }
  0x17   :  { %p72_p11 = por %p71_p10, %p70_p9 }
  0x19   :  { %p73_p12 = pnand %p72_p11, %p66_p8 }
  0x85   :  { %v23_v1 = vpop.permute.xlu0 %22 }
  0x86   :  { %24 = vst [vmem:[#allocation5] sm:$0xff] %v23_v1 }
  0x87   :  { %76 = shalt.err (!%p73_p12)
}
  0x88   :  { %s77_s0 = scalar_lea.hbm %s129_s1, 128 }
  0x89   :  { %p78_p13 = scmp.ne.s32.totalorder %s129_s1, %s77_s0  ;;  %p81_p0 = scmp.lt.u32.totalorder %s77_s0, %s129_s1 }
  0x8b   :  { %p83_p1 = pnand %p81_p0, %p78_p13 }
  0x8d   :  { %86 = shalt.err (!%p83_p1)
}
  0x8e   :  { %34 = dma.vmem_to_hbm [thread:$0]  %s32_s20, 128, %s129_s1, [#allocation4]  }
  0x8f   :  { %89 = dma.done.wait [#allocation4], 128  }
  0x90   :  { %90 = vsyncadd [#allocation4], 4294967168 }
  0x91   :  { %38 = vsyncpa [#allocation3], 1 }
  0x92   :  { %39 = vsyncpa [#allocation4], 1 }

</bundles_post_ra>
